<compile_context>
chip_gen: v7x
topology: tpu7x:2x2x1
jax: 0.10.0
libtpu: 0.0.40
codegen_flags: <defaults>
</compile_context>

<pallas_src>
import functools

import jax
import jax.numpy as jnp
from jax.experimental import pallas as pl
from jax.experimental.pallas import tpu as pltpu


def _round_up(x, m):
    return ((x + m - 1) // m) * m


def _ec_partial_sum_kernel(a_ref, n_ref, o_ref, acc_ref, *, eps, f_valid, bf, nf,
                           needs_mask):
    """Accumulates per-sample sum((|a - n| + eps)^2) over the feature chunks."""
    j = pl.program_id(2)

    @pl.when(j == 0)
    def _():
        acc_ref[...] = jnp.zeros_like(acc_ref)

    # Hot path: elementwise on a full (TB, BF) lane-dense block, f32 math.
    a = a_ref[...].astype(jnp.float32)
    n = n_ref[...].astype(jnp.float32)
    d = jnp.abs(a - n) + eps

    if needs_mask:
        # Zero lanes past the valid feature extent (ragged tail handled in-kernel
        # instead of a host-side pad pass). Masked lanes contribute exactly 0.
        col0 = (pl.program_id(1) * nf + j) * bf
        col = jax.lax.broadcasted_iota(jnp.int32, d.shape, 1) + col0
        d = jnp.where(col < f_valid, d, 0.0)

    # Per-sample partial sums: lane-tile folding is VPU adds; the final intra-vreg
    # lane reduce is a handful of XLU ops per step (free slot, HBM-bound kernel).
    acc_ref[...] += jnp.sum(d * d, axis=1, keepdims=True)

    @pl.when(j == nf - 1)
    def _():
        o_ref[...] = jnp.expand_dims(acc_ref[...], 0)


def ec_loss(anchor, negative, anchor_label, negative_label, class_statis, eps=1e-6):
    """anchor/negative: [B, C, H, W]; labels: [B] int32; class_statis: [K]."""
    assert anchor.shape == negative.shape
    B, C, H, W = anchor.shape
    F = C * H * W
    itemsize = jnp.dtype(anchor.dtype).itemsize

    # --- per-generation block-size / VMEM budget ---------------------------------
    try:
        vmem_cap = int(pltpu.get_tpu_info().vmem_capacity_bytes)
    except Exception:
        vmem_cap = 64 * 1024 * 1024                      # conservative (v7x-like)
    target_block_bytes = 4 * 1024 * 1024                 # ~4 MiB per input block
    vmem_limit = 64 * 1024 * 1024 if vmem_cap >= 128 * 1024 * 1024 else 48 * 1024 * 1024

    # --- tiling: (TB samples, BF features) blocks, no host-side padding -----------
    sub = 8 * max(1, 4 // itemsize)                      # sublane tile: 8 f32 / 16 bf16 / 32 i8
    f_cols = _round_up(F, 128)                           # lane-padded width (masked in kernel)

    tb = B if B <= sub else sub
    if tb * f_cols * itemsize <= target_block_bytes:
        bf = f_cols                                      # whole sample per block
        if B > tb:                                       # small F: fold more samples/block
            fold = (target_block_bytes // (f_cols * itemsize)) // sub * sub
            if fold > tb:
                tb = min(B, fold)
    else:                                                # large F: chunk the feature axis
        bf = max(128, min(f_cols,
                          (target_block_bytes // (tb * itemsize)) // 128 * 128))

    nb = pl.cdiv(B, tb)
    nf_total = pl.cdiv(F, bf)
    # 2-way feature split for v7x megacore balance when the batch axis alone can't.
    nsplit = 2 if (nf_total >= 2 and nf_total % 2 == 0 and nb % 2 == 1) else 1
    nf = nf_total // nsplit
    needs_mask = (F % bf) != 0

    a2 = anchor.reshape(B, F)                            # views in original dtype; no pad pass
    n2 = negative.reshape(B, F)

    kernel = functools.partial(
        _ec_partial_sum_kernel, eps=float(eps), f_valid=F, bf=bf, nf=nf,
        needs_mask=needs_mask)

    partials = pl.pallas_call(
        kernel,
        out_shape=jax.ShapeDtypeStruct((nsplit, B, 1), jnp.float32),
        grid=(nb, nsplit, nf),
        in_specs=[
            pl.BlockSpec((tb, bf), lambda b, s, j: (b, s * nf + j)),
            pl.BlockSpec((tb, bf), lambda b, s, j: (b, s * nf + j)),
        ],
        out_specs=pl.BlockSpec((1, tb, 1), lambda b, s, j: (s, b, 0)),
        scratch_shapes=[pltpu.VMEM((tb, 1), jnp.float32)],
        compiler_params=pltpu.CompilerParams(
            dimension_semantics=("parallel", "parallel", "arbitrary"),
            vmem_limit_bytes=vmem_limit,
        ),
        cost_estimate=pl.CostEstimate(
            flops=5 * B * F,
            transcendentals=0,
            bytes_accessed=2 * B * F * itemsize + nsplit * B * 4,
        ),
    )(a2, n2)

    per_sample = jnp.sum(partials[:, :, 0], axis=0)      # (B,) exact sums (no eps^2 fixup needed)

    # Per-sample joint-probability weights (cheap gather) + mean over the (C,1,W) pdist map.
    w = (1.0 / class_statis[anchor_label]) * (1.0 / class_statis[negative_label])
    return jnp.sum(w.astype(jnp.float32) * per_sample) / float(C * W)


def ec_loss_reference(anchor, negative, anchor_label, negative_label, class_statis, eps=1e-6):
    """Pure-JAX reference mirroring the PyTorch loop exactly."""
    B = anchor.shape[0]
    loss = 0.0
    for i in range(B):
        jp_a = 1.0 / class_statis[anchor_label[i]]
        jp_n = 1.0 / class_statis[negative_label[i]]
        diff = jnp.abs(anchor[i] - negative[i])
        pdist = jnp.sum((diff + eps) ** 2, axis=1, keepdims=True)  # (C, 1, W)
        loss = loss + jp_a * jp_n * pdist
    return jnp.mean(loss)


if __name__ == "__main__":
    key = jax.random.PRNGKey(0)
    k1, k2, k3, k4 = jax.random.split(key, 4)

    B, C, H, W = 2, 4, 16, 16
    NUM_CLASSES = 5

    anchor = jax.random.normal(k1, (B, C, H, W), dtype=jnp.float32)
    negative = jax.random.normal(k2, (B, C, H, W), dtype=jnp.float32)
    anchor_label = jax.random.randint(k3, (B,), 0, NUM_CLASSES, dtype=jnp.int32)
    negative_label = jax.random.randint(k4, (B,), 0, NUM_CLASSES, dtype=jnp.int32)
    # Deterministic synthetic class statistics (counts per class), strictly positive.
    class_statis = jnp.arange(1, NUM_CLASSES + 1, dtype=jnp.float32) * 10.0

    out = ec_loss(anchor, negative, anchor_label, negative_label, class_statis)
    out = jax.block_until_ready(out)

    ref = ec_loss_reference(anchor, negative, anchor_label, negative_label, class_statis)
    assert jnp.allclose(out, ref, rtol=1e-5, atol=1e-5), (out, ref)

    print("KERNEL_OK")
</pallas_src>

<mosaic_0001>
module attributes {stable_mosaic.version = 11 : i64} {
  func.func @_ec_partial_sum_kernel(%arg0: i32, %arg1: i32, %arg2: i32, %arg3: memref<2x1024xf32, #tpu.memory_space<vmem>>, %arg4: memref<2x1024xf32, #tpu.memory_space<vmem>>, %arg5: memref<1x2x1xf32, #tpu.memory_space<vmem>>, %arg6: memref<2x1xf32, #tpu.memory_space<vmem>>) attributes {dimension_semantics = [#tpu.dimension_semantics<parallel>, #tpu.dimension_semantics<parallel>, #tpu.dimension_semantics<arbitrary>], iteration_bounds = array<i64: 1, 1, 1>, scalar_prefetch = 0 : i64, scratch_operands = 1 : i64, tpu.core_type = #tpu.core_type<tc>, window_params = [{transform_indices = @transform_0, window_bounds = array<i64: 2, 1024>}, {transform_indices = @transform_1, window_bounds = array<i64: 2, 1024>}, {transform_indices = @transform_2, window_bounds = array<i64: 1, 2, 1>}]} {
    %c0_i32 = arith.constant 0 : i32
    %0 = arith.cmpi eq, %arg2, %c0_i32 : i32
    %1 = arith.extui %0 : i1 to i32
    %c0_i32_0 = arith.constant 0 : i32
    %2 = arith.cmpi ne, %1, %c0_i32_0 : i32
    scf.if %2 {
      %cst_11 = arith.constant 0.000000e+00 : f32
      %18 = vector.broadcast %cst_11 : f32 to vector<2x1xf32>
      %c0_12 = arith.constant 0 : index
      %c0_13 = arith.constant 0 : index
      %19 = vector.load %arg6[%c0_12, %c0_13] : memref<2x1xf32, #tpu.memory_space<vmem>>, vector<2x1xf32>
      tpu.vector_store %arg6[%c0_12, %c0_13], %18 {strides = array<i32>} : memref<2x1xf32, #tpu.memory_space<vmem>>, vector<2x1xf32>,
    } else {
    }
    %c0 = arith.constant 0 : index
    %c0_1 = arith.constant 0 : index
    %3 = vector.load %arg3[%c0, %c0_1] : memref<2x1024xf32, #tpu.memory_space<vmem>>, vector<2x1024xf32>
    %c0_2 = arith.constant 0 : index
    %c0_3 = arith.constant 0 : index
    %4 = vector.load %arg4[%c0_2, %c0_3] : memref<2x1024xf32, #tpu.memory_space<vmem>>, vector<2x1024xf32>
    %5 = arith.subf %3, %4 : vector<2x1024xf32>
    %6 = math.absf %5 : vector<2x1024xf32>
    %cst = arith.constant 9.99999997E-7 : f32
    %7 = vector.broadcast %cst : f32 to vector<2x1024xf32>
    %8 = arith.addf %6, %7 : vector<2x1024xf32>
    %c0_4 = arith.constant 0 : index
    %c0_5 = arith.constant 0 : index
    %9 = vector.load %arg6[%c0_4, %c0_5] : memref<2x1xf32, #tpu.memory_space<vmem>>, vector<2x1xf32>
    %10 = arith.mulf %8, %8 : vector<2x1024xf32>
    %cst_6 = arith.constant dense<0.000000e+00> : vector<2xf32>
    %11 = vector.multi_reduction <add>, %10, %cst_6 [1] : vector<2x1024xf32> to vector<2xf32>
    %12 = vector.shape_cast %11 : vector<2xf32> to vector<2x1xf32>
    %13 = arith.addf %9, %12 : vector<2x1xf32>
    %c0_7 = arith.constant 0 : index
    %c0_8 = arith.constant 0 : index
    %14 = vector.load %arg6[%c0_7, %c0_8] : memref<2x1xf32, #tpu.memory_space<vmem>>, vector<2x1xf32>
    tpu.vector_store %arg6[%c0_7, %c0_8], %13 {strides = array<i32>} : memref<2x1xf32, #tpu.memory_space<vmem>>, vector<2x1xf32>,
    %c0_i32_9 = arith.constant 0 : i32
    %15 = arith.cmpi eq, %arg2, %c0_i32_9 : i32
    %16 = arith.extui %15 : i1 to i32
    %c0_i32_10 = arith.constant 0 : i32
    %17 = arith.cmpi ne, %16, %c0_i32_10 : i32
    scf.if %17 {
      %c0_11 = arith.constant 0 : index
      %c0_12 = arith.constant 0 : index
      %18 = vector.load %arg6[%c0_11, %c0_12] : memref<2x1xf32, #tpu.memory_space<vmem>>, vector<2x1xf32>
      %19 = vector.shape_cast %18 : vector<2x1xf32> to vector<1x2x1xf32>
      %c0_13 = arith.constant 0 : index
      %c0_14 = arith.constant 0 : index
      %c0_15 = arith.constant 0 : index
      %20 = vector.load %arg5[%c0_13, %c0_14, %c0_15] : memref<1x2x1xf32, #tpu.memory_space<vmem>>, vector<1x2x1xf32>
      tpu.vector_store %arg5[%c0_13, %c0_14, %c0_15], %19 {strides = array<i32>} : memref<1x2x1xf32, #tpu.memory_space<vmem>>, vector<1x2x1xf32>,
    } else {
    }
    return
  }
  func.func @transform_0(%arg0: i32, %arg1: i32, %arg2: i32) -> (i32, i32) {
    %c1_i32 = arith.constant 1 : i32
    %0 = arith.muli %arg1, %c1_i32 : i32
    %1 = arith.addi %0, %arg2 : i32
    %c0_i32 = arith.constant 0 : i32
    return %arg0, %1 : i32, i32
  }
  func.func @transform_1(%arg0: i32, %arg1: i32, %arg2: i32) -> (i32, i32) {
    %c1_i32 = arith.constant 1 : i32
    %0 = arith.muli %arg1, %c1_i32 : i32
    %1 = arith.addi %0, %arg2 : i32
    %c0_i32 = arith.constant 0 : i32
    return %arg0, %1 : i32, i32
  }
  func.func @transform_2(%arg0: i32, %arg1: i32, %arg2: i32) -> (i32, i32, i32) {
    %c0_i32 = arith.constant 0 : i32
    %c0_i32_0 = arith.constant 0 : i32
    return %arg1, %arg0, %c0_i32 : i32, i32, i32
  }
}

</mosaic_0001>

<bundles_post_ra>
// kernel: tpu_custom_call.1
= control target key start
LH: loop header
LB: loop body
LE: loop exit
PB: predicated region body
PF: predicated region fallthrough
CT: control target
= control target key end

     0   :  { %7 = vsyncpa [#allocation4], 0  ;;  %s251_s0 = inlined_call_operand.hbm [shape: f32[2,1024], index: 0, kind: input, shape index: {}]   ;;  %s252_s1 = inlined_call_operand.hbm [shape: f32[2,1024], index: 1, kind: input, shape index: {}]   ;;  %s253_s2 = inlined_call_operand.vmem [shape: f32[1,2,1], index: 2, kind: output, shape index: {}]  }
   0x1   :  { %8 = vsyncpa [#allocation6], 0  ;;  %s194_s9 = smov [#allocation3]   ;;  %s195_s11 = smov [#allocation5]  }
   0x2   :  { %s19_s10 = sshll.u32 %s194_s9, 4  ;;  %s33_s12 = sshll.u32 %s195_s11, 4  ;;  %s20_s10 = int_to_ptr.vmem [resolvable:$true] %s19_s10  ;;  %s34_s12 = int_to_ptr.vmem [resolvable:$true] %s33_s12 }
   0x3   :  { %s146_s15 = scalar_lea.hbm %s251_s0, 256 }
   0x4   :  { %p147_p0 = scmp.ne.s32.totalorder %s251_s0, %s146_s15  ;;  %p150_p1 = scmp.lt.u32.totalorder %s146_s15, %s251_s0 }
   0x6   :  { %p152_p2 = pnand %p150_p1, %p147_p0 }
   0x8   :  { %155 = shalt.err (!%p152_p2)
}
   0x9   :  { %s156_s20 = scalar_lea.vmem %s20_s10, 256  ;;  %p161_p4 = scmp.lt.s32.totalorder %s20_s10, %s20_s10 }
   0xa   :  { %p157_p3 = scmp.ne.s32.totalorder %s20_s10, %s156_s20  ;;  %p162_p5 = scmp.lt.s32.totalorder %s156_s20, %s156_s20 }
   0xc   :  { %p163_p6 = por %p162_p5, %p161_p4 }
   0xe   :  { %p164_p7 = pnand %p163_p6, %p157_p3 }
  0x10   :  { %167 = shalt.err (!%p164_p7)
}
  0x11   :  { %22 = dma.hbm_to_vmem [thread:$0]  %s251_s0, 256, %s20_s10, [#allocation4]  }
  0x12   :  { %s168_s25 = scalar_lea.hbm %s252_s1, 256 }
  0x13   :  { %p169_p8 = scmp.ne.s32.totalorder %s252_s1, %s168_s25  ;;  %p172_p9 = scmp.lt.u32.totalorder %s168_s25, %s252_s1 }
  0x15   :  { %p174_p10 = pnand %p172_p9, %p169_p8 }
  0x17   :  { %177 = shalt.err (!%p174_p10)
}
  0x18   :  { %s178_s30 = scalar_lea.vmem %s34_s12, 256  ;;  %p183_p12 = scmp.lt.s32.totalorder %s34_s12, %s34_s12 }
  0x19   :  { %p179_p11 = scmp.ne.s32.totalorder %s34_s12, %s178_s30  ;;  %p184_p13 = scmp.lt.s32.totalorder %s178_s30, %s178_s30 }
  0x1b   :  { %p185_p0 = por %p184_p13, %p183_p12 }
  0x1d   :  { %p186_p1 = pnand %p185_p0, %p179_p11 }
  0x1f   :  { %189 = shalt.err (!%p186_p1)
}
  0x20   :  { %36 = dma.hbm_to_vmem [thread:$0]  %s252_s1, 256, %s34_s12, [#allocation6]  }
  0x21   :  { %190 = dma.done.wait [#allocation4], 256  }
  0x22   :  { %191 = vsyncadd [#allocation4], 4294967040 }
  0x23   :  { %192 = dma.done.wait [#allocation6], 256  }
  0x24   :  { %193 = vsyncadd [#allocation6], 4294967040  ;;  %vm51_vm0 = vcmask 1024   ;;  %v196_v0 = vmov 0.0   ;;  %v197_v1 = vmov 1983009808   ;;  %v72_v3 = vlaneseq }
  0x25   :  { %52 = vst.msk [vmem:[#allocation2] sm:$0x3] %vm51_vm0, %v196_v0  ;;  %v70_v2 = vunpack.c.l.s4 %v197_v1  ;;  %v53_v4 = vld [vmem:[#allocation3] sm:$0xff]  ;;  %v54_v5 = vld [vmem:[#allocation3 + $0x8] sm:$0xff]  ;;  %v55_v6 = vld [vmem:[#allocation5] sm:$0xff]  ;;  %vm110_vm1 = vcmask 1041408  }
  0x26   :  { %v56_v7 = vld [vmem:[#allocation5 + $0x8] sm:$0xff]  ;;  %v57_v8 = vsub.f32 %v53_v4, %v55_v6  ;;  %v73_v10 = vshrl.u32 %v72_v3, 7 }
  0x27   :  { %v71_v9 = vunpack.c.0.s8 %v70_v2  ;;  %v58_v11 = vsub.f32 %v54_v5, %v56_v7 }
  0x28   :  { %v59_v12 = vand.u32 2147483647, %v57_v8 }
  0x29   :  { %v60_v13 = vand.u32 2147483647, %v58_v11  ;;  %v74_v15 = vsub.s32 %v71_v9, %v73_v10 }
  0x2a   :  { %v61_v14 = vadd.f32 1e-06, %v59_v12 }
  0x2b   :  { %v62_v16 = vadd.f32 1e-06, %v60_v13 }
  0x2c   :  { %v64_v17 = vmul.f32 %v61_v14, %v61_v14  ;;  %v63_v44 = vld [vmem:[#allocation2] sm:$0x3] }
  0x2d   :  { %v65_v18 = vmul.f32 %v62_v16, %v62_v16 }
  0x2e   :  { %v68_v19 = vcombine.high %v64_v17, %v64_v17  ;;  %v75_v20 = vrot.slane %v64_v17, %v74_v15 }
  0x2f   :  { %v85_v21 = vcombine.high %v65_v18, %v65_v18  ;;  %v92_v24 = vrot.slane %v65_v18, %v74_v15 }
  0x30   :  { %v82_v22 = vrot.slane %v68_v19, %v74_v15  ;;  %v83_v23 = vcombine.high %v75_v20, %v75_v20  ;;  %v111_v25 = vsel %vm110_vm1, %v75_v20, 0.0 }
  0x31   :  { %v99_v30 = vrot.slane %v85_v21, %v74_v15  ;;  %v100_v31 = vcombine.high %v92_v24, %v92_v24  ;;  %v118_v34 = vsel %vm110_vm1, %v92_v24, 0.0 }
  0x32   :  { %v84_v26 = vcombine.high %v82_v22, %v82_v22  ;;  %v112_v27 = vsel %vm110_vm1, %v83_v23, 0.0  ;;  %v114_v28 = vsel %vm110_vm1, %v82_v22, 0.0 }
  0x33   :  { %v113_v29 = vadd.f32 %v112_v27, %v111_v25  ;;  %v101_v36 = vcombine.high %v99_v30, %v99_v30  ;;  %v120_v37 = vsel %vm110_vm1, %v100_v31, 0.0  ;;  %v122_v39 = vsel %vm110_vm1, %v99_v30, 0.0 }
  0x34   :  { %v116_v32 = vsel %vm110_vm1, %v84_v26, 0.0 }
  0x35   :  { %v115_v33 = vadd.f32 %v114_v28, %v113_v29  ;;  %v124_v41 = vsel %vm110_vm1, %v101_v36, 0.0 }
  0x37   :  { %v117_v35 = vadd.f32 %v116_v32, %v115_v33 }
  0x39   :  { %v119_v38 = vadd.f32 %v118_v34, %v117_v35 }
  0x3b   :  { %v121_v40 = vadd.f32 %v120_v37, %v119_v38 }
  0x3d   :  { %v123_v42 = vadd.f32 %v122_v39, %v121_v40 }
  0x3f   :  { %v125_v43 = vadd.f32 %v124_v41, %v123_v42 }
  0x41   :  { %126 = vadd.xlane.f32.xlu0 %v125_v43 }
  0xce   :  { %v127_v45 = vpop.xlane.xlu0 %126 }
  0xcf   :  { %v128_v46 = vadd.f32 %v127_v45, %v63_v44 }
  0xd1   :  { %130 = vst.msk [vmem:[#allocation2] sm:$0x3] %vm51_vm0, %v128_v46 }
  0xd8   :  { %v134_v47 = vld [vmem:[#allocation2] sm:$0x3] }
  0xd9   :  { %135 = vst.msk [vmem:[%s253_s2] sm:$0x3] %vm51_vm0, %v134_v47 }
  0xda   :  { %140 = vsyncpa [#allocation4], 1 }
  0xdb   :  { %141 = vsyncpa [#allocation6], 1 }

</bundles_post_ra>
